<compile_context>
chip_gen: v7x
topology: tpu7x:2x2x1
jax: 0.10.0
libtpu: 0.0.40
codegen_flags: <defaults>
</compile_context>

<pallas_src>
import functools

import jax
import jax.numpy as jnp
from jax import lax
from jax.experimental import pallas as pl
from jax.experimental.pallas import tpu as pltpu


def _csam_kernel(w_ref, p_ref, idx_ref, x_rows_ref, x_ref, o_ref,
                 halo_buf, halo_sem, *, H, W):
    # w_ref      : SMEM (27,)            3x3x3 conv weight, flattened [kd,kh,kw]
    # p_ref      : SMEM (2,)             [conv bias, scale]
    # idx_ref    : VMEM (2, H*W) int32   per-lane [row h, col w] of the plane
    # x_rows_ref : ANY  (N*C, H*W)       full input (HBM) -- only for halo DMAs
    # x_ref      : VMEM (1, CT, H*W)     current channel tile (auto-pipelined)
    # o_ref      : VMEM (1, CT, H*W)     output tile
    # halo_buf   : VMEM (2, 1, H*W)      [channel c0-1, channel c0+CT] rows
    # halo_sem   : DMA semaphores (2,)
    b = pl.program_id(0)
    j = pl.program_id(1)
    n_ct = pl.num_programs(1)
    c_tile = x_ref.shape[1]
    HW = H * W
    c_total = n_ct * c_tile

    # ---- start the two channel-halo row DMAs (clamped; zeroed below) --------
    base = b * c_total
    top_row = base + jnp.maximum(j * c_tile - 1, 0)
    bot_row = base + jnp.minimum(j * c_tile + c_tile, c_total - 1)
    top_cp = pltpu.make_async_copy(x_rows_ref.at[pl.ds(top_row, 1)],
                                   halo_buf.at[0], halo_sem.at[0])
    bot_cp = pltpu.make_async_copy(x_rows_ref.at[pl.ds(bot_row, 1)],
                                   halo_buf.at[1], halo_sem.at[1])
    top_cp.start()
    bot_cp.start()

    # ---- per-lane (h, w) coordinates -> edge masks for the zero padding -----
    h_idx = idx_ref[0:1, :]                      # (1, HW) int32
    w_idx = idx_ref[1:2, :]                      # (1, HW) int32
    not_top = h_idx >= 1                         # h-1 in range
    not_bot = h_idx <= H - 2                     # h+1 in range
    not_left = w_idx >= 1                        # w-1 in range
    not_right = w_idx <= W - 2                   # w+1 in range

    x_t = x_ref[0].astype(jnp.float32)           # (CT, HW)

    top_cp.wait()
    bot_cp.wait()
    top_flag = (j > 0).astype(jnp.float32)               # 0 at c == 0 boundary
    bot_flag = (j < n_ct - 1).astype(jnp.float32)        # 0 at c == C-1 boundary
    halo_top = halo_buf[0].astype(jnp.float32) * top_flag    # (1, HW)
    halo_bot = halo_buf[1].astype(jnp.float32) * bot_flag    # (1, HW)

    # Channel-shifted views, built once and reused across all 9 spatial taps.
    if c_tile > 1:
        x_cm = jnp.concatenate([halo_top, x_t[:c_tile - 1]], axis=0)  # x[c-1]
        x_cp = jnp.concatenate([x_t[1:], halo_bot], axis=0)           # x[c+1]
    else:
        x_cm, x_cp = halo_top, halo_bot

    # 3x3x3 conv: for each spatial tap (dh, dw), combine the 3 channel views
    # with their scalar weights, lane-roll the flattened plane by dh*W + dw,
    # and mask positions that fell off the (zero-padded) image.
    accs = []
    for dh in (-1, 0, 1):
        acc_h = None
        for dw in (-1, 0, 1):
            kh, kw = dh + 1, dw + 1
            comb = (w_ref[0 * 9 + kh * 3 + kw] * x_cm
                    + w_ref[1 * 9 + kh * 3 + kw] * x_t
                    + w_ref[2 * 9 + kh * 3 + kw] * x_cp)
            shift = (-(dh * W + dw)) % HW        # static, non-negative
            if shift != 0:
                comb = pltpu.roll(comb, shift=shift, axis=1)
            conds = []
            if dh == -1:
                conds.append(not_top)
            elif dh == 1:
                conds.append(not_bot)
            if dw == -1:
                conds.append(not_left)
            elif dw == 1:
                conds.append(not_right)
            if conds:
                m = conds[0]
                for extra in conds[1:]:
                    m = jnp.logical_and(m, extra)
                comb = jnp.where(m, comb, 0.0)
            acc_h = comb if acc_h is None else acc_h + comb
        accs.append(acc_h)

    conv = accs[0] + accs[1] + accs[2] + p_ref[0]        # + bias
    sig = 1.0 / (1.0 + jnp.exp(-conv))                   # sigmoid (exp on EUP)
    res = p_ref[1] * sig * x_t + x_t                     # scale * attn * x + x
    o_ref[0] = res.astype(o_ref.dtype)


def channel_spatial_attention(x, w3d, bias, scale, *, c_tile=8):
    """x: (n, c, h, w); w3d: (3,3,3); bias, scale: scalars. Returns (n,c,h,w)."""
    n, c, h, w = x.shape
    hw = h * w

    # Channel tile must be a multiple of 8 that divides c (or the full c).
    if c % c_tile != 0 or c_tile % 8 != 0:
        c_tile = c
    num_ct = c // c_tile

    x_flat = x.reshape(n, c, hw)        # free reshape (contiguous), lane-dense
    x_rows = x.reshape(n * c, hw)       # same buffer, one row per channel
    w_flat = w3d.reshape(27).astype(jnp.float32)
    params = jnp.stack([jnp.asarray(bias, jnp.float32),
                        jnp.asarray(scale, jnp.float32)])
    # Per-lane (h, w) coordinates of the flattened plane, for the edge masks.
    hw_idx = jnp.stack(
        [jnp.repeat(jnp.arange(h, dtype=jnp.int32), w),
         jnp.tile(jnp.arange(w, dtype=jnp.int32), h)], axis=0)        # (2, hw)

    kernel = functools.partial(_csam_kernel, H=h, W=w)

    out_flat = pl.pallas_call(
        kernel,
        out_shape=jax.ShapeDtypeStruct((n, c, hw), x.dtype),
        grid_spec=pltpu.PrefetchScalarGridSpec(
            num_scalar_prefetch=0,
            grid=(n, num_ct),
            in_specs=[
                pl.BlockSpec(memory_space=pltpu.MemorySpace.SMEM),      # weights
                pl.BlockSpec(memory_space=pltpu.MemorySpace.SMEM),      # bias,scale
                pl.BlockSpec((2, hw), lambda i, j: (0, 0)),             # (h,w) idx
                pl.BlockSpec(memory_space=pl.ANY),                      # x rows (HBM)
                pl.BlockSpec((1, c_tile, hw), lambda i, j: (i, j, 0)),  # x tile
            ],
            out_specs=pl.BlockSpec((1, c_tile, hw), lambda i, j: (i, j, 0)),
            scratch_shapes=[
                pltpu.VMEM((2, 1, hw), x.dtype),       # channel-halo rows
                pltpu.SemaphoreType.DMA((2,)),
            ],
        ),
        compiler_params=pltpu.CompilerParams(
            dimension_semantics=("parallel", "parallel")),
    )(w_flat, params, hw_idx, x_rows, x_flat)
    return out_flat.reshape(n, c, h, w)


def _reference(x, w3d, bias, scale):
    n, c, h, w = x.shape
    x5 = x.reshape(n, 1, c, h, w)
    k = w3d.reshape(1, 1, 3, 3, 3)
    conv = lax.conv_general_dilated(
        x5, k, window_strides=(1, 1, 1),
        padding=[(1, 1), (1, 1), (1, 1)],
        dimension_numbers=("NCDHW", "OIDHW", "NCDHW"))
    conv = conv + bias
    sig = jax.nn.sigmoid(conv).reshape(n, c, h, w)
    return scale * sig * x + x


if __name__ == "__main__":
    key = jax.random.PRNGKey(0)
    k1, k2 = jax.random.split(key)

    # Conv3d(1,1,3) parameters (weight (3,3,3), bias scalar).
    w3d = 0.1 * jax.random.normal(k2, (3, 3, 3), dtype=jnp.float32)
    bias = jnp.float32(0.1)
    # NOTE: PyTorch inits self.scale to zero (output == x); use a nonzero value
    # so the attention path is actually exercised.
    scale = jnp.float32(0.5)

    # Config 1: channel-tiled path (c=24 -> three 8-channel tiles, exercising
    # first / interior / last halo cases).
    n, c, h, w = 2, 24, 16, 16
    x = jax.random.normal(k1, (n, c, h, w), dtype=jnp.float32)
    out = channel_spatial_attention(x, w3d, bias, scale, c_tile=8)
    jax.block_until_ready(out)
    ref = _reference(x, w3d, bias, scale)
    assert out.shape == (n, c, h, w)
    assert jnp.allclose(out, ref, atol=1e-5, rtol=1e-5), "mismatch (tiled)"

    # Config 2: small channel count -> single-tile fallback path.
    x2 = jax.random.normal(k1, (2, 4, 16, 16), dtype=jnp.float32)
    out2 = channel_spatial_attention(x2, w3d, bias, scale)
    jax.block_until_ready(out2)
    ref2 = _reference(x2, w3d, bias, scale)
    assert jnp.allclose(out2, ref2, atol=1e-5, rtol=1e-5), "mismatch (single tile)"

    print("KERNEL_OK")
</pallas_src>

<mosaic_0001>
module attributes {stable_mosaic.version = 11 : i64} {
  func.func @_csam_kernel(%arg0: i32, %arg1: i32, %arg2: memref<27xf32, #tpu.memory_space<smem>>, %arg3: memref<2xf32, #tpu.memory_space<smem>>, %arg4: memref<2x256xi32, #tpu.memory_space<vmem>>, %arg5: memref<48x256xf32, #tpu.memory_space<any>>, %arg6: memref<1x8x256xf32, #tpu.memory_space<vmem>>, %arg7: memref<1x8x256xf32, #tpu.memory_space<vmem>>, %arg8: memref<2x1x256xf32, #tpu.memory_space<vmem>>, %arg9: memref<2x!tpu.dma_semaphore, #tpu.memory_space<semaphore_mem>>) attributes {dimension_semantics = [#tpu.dimension_semantics<parallel>, #tpu.dimension_semantics<parallel>], iteration_bounds = array<i64: 2, 3>, scalar_prefetch = 0 : i64, scratch_operands = 2 : i64, tpu.core_type = #tpu.core_type<tc>, window_params = [{transform_indices = @transform_0, window_bounds = array<i64: 27>}, {transform_indices = @transform_1, window_bounds = array<i64: 2>}, {pipeline_mode = #tpu.pipeline_mode<synchronous>, transform_indices = @transform_2, window_bounds = array<i64: 2, 256>}, {}, {transform_indices = @transform_4, window_bounds = array<i64: 1, 8, 256>}, {transform_indices = @transform_5, window_bounds = array<i64: 1, 8, 256>}]} {
    %c24_i32 = arith.constant 24 : i32
    %0 = arith.muli %arg0, %c24_i32 : i32
    %c8_i32 = arith.constant 8 : i32
    %1 = arith.muli %arg1, %c8_i32 : i32
    %c1_i32 = arith.constant 1 : i32
    %2 = arith.subi %1, %c1_i32 : i32
    %c0_i32 = arith.constant 0 : i32
    %3 = arith.maxsi %2, %c0_i32 : i32
    %4 = arith.addi %0, %3 : i32
    %c8_i32_0 = arith.constant 8 : i32
    %5 = arith.muli %arg1, %c8_i32_0 : i32
    %c8_i32_1 = arith.constant 8 : i32
    %6 = arith.addi %5, %c8_i32_1 : i32
    %c23_i32 = arith.constant 23 : i32
    %7 = arith.minsi %6, %c23_i32 : i32
    %8 = arith.addi %0, %7 : i32
    %c0_i32_2 = arith.constant 0 : i32
    %c0_i32_3 = arith.constant 0 : i32
    %c0_i32_4 = arith.constant 0 : i32
    %9 = tpu.memref_slice %arg5[%4, %c0_i32_4] : memref<48x256xf32, #tpu.memory_space<any>> -> memref<1x256xf32, #tpu.memory_space<any>>
    %c0_i32_5 = arith.constant 0 : i32
    %c0_i32_6 = arith.constant 0 : i32
    %10 = tpu.memref_slice %arg8[%c0_i32_2, %c0_i32_5, %c0_i32_6] : memref<2x1x256xf32, #tpu.memory_space<vmem>> -> memref<1x1x256xf32, #tpu.memory_space<vmem>>
    %11 = tpu.memref_squeeze %10 : memref<1x1x256xf32, #tpu.memory_space<vmem>> -> memref<1x256xf32, #tpu.memory_space<vmem>>
    %12 = tpu.memref_slice %arg9[%c0_i32_3] : memref<2x!tpu.dma_semaphore, #tpu.memory_space<semaphore_mem>> -> memref<1x!tpu.dma_semaphore, #tpu.memory_space<semaphore_mem>>
    %13 = tpu.memref_squeeze %12 : memref<1x!tpu.dma_semaphore, #tpu.memory_space<semaphore_mem>> -> memref<!tpu.dma_semaphore, #tpu.memory_space<semaphore_mem>>
    tpu.enqueue_dma source(%9 : memref<1x256xf32, #tpu.memory_space<any>>) target(%11 : memref<1x256xf32, #tpu.memory_space<vmem>>) target_semaphore(%13 : memref<!tpu.dma_semaphore, #tpu.memory_space<semaphore_mem>>)
    %c1_i32_7 = arith.constant 1 : i32
    %c1_i32_8 = arith.constant 1 : i32
    %c0_i32_9 = arith.constant 0 : i32
    %14 = tpu.memref_slice %arg5[%8, %c0_i32_9] : memref<48x256xf32, #tpu.memory_space<any>> -> memref<1x256xf32, #tpu.memory_space<any>>
    %c0_i32_10 = arith.constant 0 : i32
    %c0_i32_11 = arith.constant 0 : i32
    %15 = tpu.memref_slice %arg8[%c1_i32_7, %c0_i32_10, %c0_i32_11] : memref<2x1x256xf32, #tpu.memory_space<vmem>> -> memref<1x1x256xf32, #tpu.memory_space<vmem>>
    %16 = tpu.memref_squeeze %15 : memref<1x1x256xf32, #tpu.memory_space<vmem>> -> memref<1x256xf32, #tpu.memory_space<vmem>>
    %17 = tpu.memref_slice %arg9[%c1_i32_8] : memref<2x!tpu.dma_semaphore, #tpu.memory_space<semaphore_mem>> -> memref<1x!tpu.dma_semaphore, #tpu.memory_space<semaphore_mem>>
    %18 = tpu.memref_squeeze %17 : memref<1x!tpu.dma_semaphore, #tpu.memory_space<semaphore_mem>> -> memref<!tpu.dma_semaphore, #tpu.memory_space<semaphore_mem>>
    tpu.enqueue_dma source(%14 : memref<1x256xf32, #tpu.memory_space<any>>) target(%16 : memref<1x256xf32, #tpu.memory_space<vmem>>) target_semaphore(%18 : memref<!tpu.dma_semaphore, #tpu.memory_space<semaphore_mem>>)
    %c0 = arith.constant 0 : index
    %c0_12 = arith.constant 0 : index
    %19 = vector.load %arg4[%c0, %c0_12] : memref<2x256xi32, #tpu.memory_space<vmem>>, vector<1x256xi32>
    %c1 = arith.constant 1 : index
    %c0_13 = arith.constant 0 : index
    %20 = vector.load %arg4[%c1, %c0_13] : memref<2x256xi32, #tpu.memory_space<vmem>>, vector<1x256xi32>
    %c1_i32_14 = arith.constant 1 : i32
    %21 = vector.broadcast %c1_i32_14 : i32 to vector<1x256xi32>
    %22 = arith.cmpi sge, %19, %21 : vector<1x256xi32>
    %c14_i32 = arith.constant 14 : i32
    %23 = vector.broadcast %c14_i32 : i32 to vector<1x256xi32>
    %24 = arith.cmpi sle, %19, %23 : vector<1x256xi32>
    %c1_i32_15 = arith.constant 1 : i32
    %25 = vector.broadcast %c1_i32_15 : i32 to vector<1x256xi32>
    %26 = arith.cmpi sge, %20, %25 : vector<1x256xi32>
    %c14_i32_16 = arith.constant 14 : i32
    %27 = vector.broadcast %c14_i32_16 : i32 to vector<1x256xi32>
    %28 = arith.cmpi sle, %20, %27 : vector<1x256xi32>
    %c0_17 = arith.constant 0 : index
    %c0_18 = arith.constant 0 : index
    %c0_19 = arith.constant 0 : index
    %29 = vector.load %arg6[%c0_17, %c0_18, %c0_19] : memref<1x8x256xf32, #tpu.memory_space<vmem>>, vector<1x8x256xf32>
    %30 = vector.shape_cast %29 : vector<1x8x256xf32> to vector<8x256xf32>
    %c0_i32_20 = arith.constant 0 : i32
    %c0_i32_21 = arith.constant 0 : i32
    %c0_i32_22 = arith.constant 0 : i32
    %31 = tpu.memref_slice %arg5[%4, %c0_i32_22] : memref<48x256xf32, #tpu.memory_space<any>> -> memref<1x256xf32, #tpu.memory_space<any>>
    %c0_i32_23 = arith.constant 0 : i32
    %c0_i32_24 = arith.constant 0 : i32
    %32 = tpu.memref_slice %arg8[%c0_i32_20, %c0_i32_23, %c0_i32_24] : memref<2x1x256xf32, #tpu.memory_space<vmem>> -> memref<1x1x256xf32, #tpu.memory_space<vmem>>
    %33 = tpu.memref_squeeze %32 : memref<1x1x256xf32, #tpu.memory_space<vmem>> -> memref<1x256xf32, #tpu.memory_space<vmem>>
    %34 = tpu.memref_slice %arg9[%c0_i32_21] : memref<2x!tpu.dma_semaphore, #tpu.memory_space<semaphore_mem>> -> memref<1x!tpu.dma_semaphore, #tpu.memory_space<semaphore_mem>>
    %35 = tpu.memref_squeeze %34 : memref<1x!tpu.dma_semaphore, #tpu.memory_space<semaphore_mem>> -> memref<!tpu.dma_semaphore, #tpu.memory_space<semaphore_mem>>
    tpu.wait_dma2 semaphore(%35 : memref<!tpu.dma_semaphore, #tpu.memory_space<semaphore_mem>>) src(%31 : memref<1x256xf32, #tpu.memory_space<any>>) dst(%33 : memref<1x256xf32, #tpu.memory_space<vmem>>)
    %c1_i32_25 = arith.constant 1 : i32
    %c1_i32_26 = arith.constant 1 : i32
    %c0_i32_27 = arith.constant 0 : i32
    %36 = tpu.memref_slice %arg5[%8, %c0_i32_27] : memref<48x256xf32, #tpu.memory_space<any>> -> memref<1x256xf32, #tpu.memory_space<any>>
    %c0_i32_28 = arith.constant 0 : i32
    %c0_i32_29 = arith.constant 0 : i32
    %37 = tpu.memref_slice %arg8[%c1_i32_25, %c0_i32_28, %c0_i32_29] : memref<2x1x256xf32, #tpu.memory_space<vmem>> -> memref<1x1x256xf32, #tpu.memory_space<vmem>>
    %38 = tpu.memref_squeeze %37 : memref<1x1x256xf32, #tpu.memory_space<vmem>> -> memref<1x256xf32, #tpu.memory_space<vmem>>
    %39 = tpu.memref_slice %arg9[%c1_i32_26] : memref<2x!tpu.dma_semaphore, #tpu.memory_space<semaphore_mem>> -> memref<1x!tpu.dma_semaphore, #tpu.memory_space<semaphore_mem>>
    %40 = tpu.memref_squeeze %39 : memref<1x!tpu.dma_semaphore, #tpu.memory_space<semaphore_mem>> -> memref<!tpu.dma_semaphore, #tpu.memory_space<semaphore_mem>>
    tpu.wait_dma2 semaphore(%40 : memref<!tpu.dma_semaphore, #tpu.memory_space<semaphore_mem>>) src(%36 : memref<1x256xf32, #tpu.memory_space<any>>) dst(%38 : memref<1x256xf32, #tpu.memory_space<vmem>>)
    %c0_i32_30 = arith.constant 0 : i32
    %41 = arith.cmpi sgt, %arg1, %c0_i32_30 : i32
    %42 = arith.extui %41 : i1 to i32
    %43 = arith.sitofp %42 : i32 to f32
    %c2_i32 = arith.constant 2 : i32
    %44 = arith.cmpi slt, %arg1, %c2_i32 : i32
    %45 = arith.extui %44 : i1 to i32
    %46 = arith.sitofp %45 : i32 to f32
    %c0_31 = arith.constant 0 : index
    %c0_32 = arith.constant 0 : index
    %c0_33 = arith.constant 0 : index
    %47 = vector.load %arg8[%c0_31, %c0_32, %c0_33] : memref<2x1x256xf32, #tpu.memory_space<vmem>>, vector<1x1x256xf32>
    %48 = vector.shape_cast %47 : vector<1x1x256xf32> to vector<1x256xf32>
    %49 = vector.broadcast %43 : f32 to vector<1x256xf32>
    %50 = arith.mulf %48, %49 : vector<1x256xf32>
    %c1_34 = arith.constant 1 : index
    %c0_35 = arith.constant 0 : index
    %c0_36 = arith.constant 0 : index
    %51 = vector.load %arg8[%c1_34, %c0_35, %c0_36] : memref<2x1x256xf32, #tpu.memory_space<vmem>>, vector<1x1x256xf32>
    %52 = vector.shape_cast %51 : vector<1x1x256xf32> to vector<1x256xf32>
    %53 = vector.broadcast %46 : f32 to vector<1x256xf32>
    %54 = arith.mulf %52, %53 : vector<1x256xf32>
    %55 = vector.extract_strided_slice %30 {offsets = [0, 0], sizes = [7, 256], strides = [1, 1]} : vector<8x256xf32> to vector<7x256xf32>
    %56 = tpu.concatenate %50, %55 in 0 : vector<1x256xf32>, vector<7x256xf32> -> vector<8x256xf32>
    %57 = vector.extract_strided_slice %30 {offsets = [1, 0], sizes = [7, 256], strides = [1, 1]} : vector<8x256xf32> to vector<7x256xf32>
    %58 = tpu.concatenate %57, %54 in 0 : vector<7x256xf32>, vector<1x256xf32> -> vector<8x256xf32>
    %c0_37 = arith.constant 0 : index
    %59 = memref.load %arg2[%c0_37] : memref<27xf32, #tpu.memory_space<smem>>
    %60 = vector.broadcast %59 : f32 to vector<8x256xf32>
    %61 = arith.mulf %60, %56 : vector<8x256xf32>
    %c9 = arith.constant 9 : index
    %62 = memref.load %arg2[%c9] : memref<27xf32, #tpu.memory_space<smem>>
    %63 = vector.broadcast %62 : f32 to vector<8x256xf32>
    %64 = arith.mulf %63, %30 : vector<8x256xf32>
    %65 = arith.addf %61, %64 : vector<8x256xf32>
    %c18 = arith.constant 18 : index
    %66 = memref.load %arg2[%c18] : memref<27xf32, #tpu.memory_space<smem>>
    %67 = vector.broadcast %66 : f32 to vector<8x256xf32>
    %68 = arith.mulf %67, %58 : vector<8x256xf32>
    %69 = arith.addf %65, %68 : vector<8x256xf32>
    %c17_i32 = arith.constant 17 : i32
    %70 = tpu.dynamic_rotate %69 by %c17_i32 dim 1 : vector<8x256xf32>, i32 -> vector<8x256xf32>
    %71 = arith.andi %22, %26 : vector<1x256xi1>
    %cst = arith.constant 0.000000e+00 : f32
    %72 = vector.shape_cast %71 : vector<1x256xi1> to vector<1x256xi1>
    %73 = vector.broadcast %72 : vector<1x256xi1> to vector<8x256xi1>
    %74 = vector.broadcast %cst : f32 to vector<8x256xf32>
    %75 = arith.select %73, %70, %74 : vector<8x256xi1>, vector<8x256xf32>
    %c1_38 = arith.constant 1 : index
    %76 = memref.load %arg2[%c1_38] : memref<27xf32, #tpu.memory_space<smem>>
    %77 = vector.broadcast %76 : f32 to vector<8x256xf32>
    %78 = arith.mulf %77, %56 : vector<8x256xf32>
    %c10 = arith.constant 10 : index
    %79 = memref.load %arg2[%c10] : memref<27xf32, #tpu.memory_space<smem>>
    %80 = vector.broadcast %79 : f32 to vector<8x256xf32>
    %81 = arith.mulf %80, %30 : vector<8x256xf32>
    %82 = arith.addf %78, %81 : vector<8x256xf32>
    %c19 = arith.constant 19 : index
    %83 = memref.load %arg2[%c19] : memref<27xf32, #tpu.memory_space<smem>>
    %84 = vector.broadcast %83 : f32 to vector<8x256xf32>
    %85 = arith.mulf %84, %58 : vector<8x256xf32>
    %86 = arith.addf %82, %85 : vector<8x256xf32>
    %c16_i32 = arith.constant 16 : i32
    %87 = tpu.dynamic_rotate %86 by %c16_i32 dim 1 : vector<8x256xf32>, i32 -> vector<8x256xf32>
    %cst_39 = arith.constant 0.000000e+00 : f32
    %88 = vector.shape_cast %22 : vector<1x256xi1> to vector<1x256xi1>
    %89 = vector.broadcast %88 : vector<1x256xi1> to vector<8x256xi1>
    %90 = vector.broadcast %cst_39 : f32 to vector<8x256xf32>
    %91 = arith.select %89, %87, %90 : vector<8x256xi1>, vector<8x256xf32>
    %92 = arith.addf %75, %91 : vector<8x256xf32>
    %c2 = arith.constant 2 : index
    %93 = memref.load %arg2[%c2] : memref<27xf32, #tpu.memory_space<smem>>
    %94 = vector.broadcast %93 : f32 to vector<8x256xf32>
    %95 = arith.mulf %94, %56 : vector<8x256xf32>
    %c11 = arith.constant 11 : index
    %96 = memref.load %arg2[%c11] : memref<27xf32, #tpu.memory_space<smem>>
    %97 = vector.broadcast %96 : f32 to vector<8x256xf32>
    %98 = arith.mulf %97, %30 : vector<8x256xf32>
    %99 = arith.addf %95, %98 : vector<8x256xf32>
    %c20 = arith.constant 20 : index
    %100 = memref.load %arg2[%c20] : memref<27xf32, #tpu.memory_space<smem>>
    %101 = vector.broadcast %100 : f32 to vector<8x256xf32>
    %102 = arith.mulf %101, %58 : vector<8x256xf32>
    %103 = arith.addf %99, %102 : vector<8x256xf32>
    %c15_i32 = arith.constant 15 : i32
    %104 = tpu.dynamic_rotate %103 by %c15_i32 dim 1 : vector<8x256xf32>, i32 -> vector<8x256xf32>
    %105 = arith.andi %22, %28 : vector<1x256xi1>
    %cst_40 = arith.constant 0.000000e+00 : f32
    %106 = vector.shape_cast %105 : vector<1x256xi1> to vector<1x256xi1>
    %107 = vector.broadcast %106 : vector<1x256xi1> to vector<8x256xi1>
    %108 = vector.broadcast %cst_40 : f32 to vector<8x256xf32>
    %109 = arith.select %107, %104, %108 : vector<8x256xi1>, vector<8x256xf32>
    %110 = arith.addf %92, %109 : vector<8x256xf32>
    %c3 = arith.constant 3 : index
    %111 = memref.load %arg2[%c3] : memref<27xf32, #tpu.memory_space<smem>>
    %112 = vector.broadcast %111 : f32 to vector<8x256xf32>
    %113 = arith.mulf %112, %56 : vector<8x256xf32>
    %c12 = arith.constant 12 : index
    %114 = memref.load %arg2[%c12] : memref<27xf32, #tpu.memory_space<smem>>
    %115 = vector.broadcast %114 : f32 to vector<8x256xf32>
    %116 = arith.mulf %115, %30 : vector<8x256xf32>
    %117 = arith.addf %113, %116 : vector<8x256xf32>
    %c21 = arith.constant 21 : index
    %118 = memref.load %arg2[%c21] : memref<27xf32, #tpu.memory_space<smem>>
    %119 = vector.broadcast %118 : f32 to vector<8x256xf32>
    %120 = arith.mulf %119, %58 : vector<8x256xf32>
    %121 = arith.addf %117, %120 : vector<8x256xf32>
    %c1_i32_41 = arith.constant 1 : i32
    %122 = tpu.dynamic_rotate %121 by %c1_i32_41 dim 1 : vector<8x256xf32>, i32 -> vector<8x256xf32>
    %cst_42 = arith.constant 0.000000e+00 : f32
    %123 = vector.shape_cast %26 : vector<1x256xi1> to vector<1x256xi1>
    %124 = vector.broadcast %123 : vector<1x256xi1> to vector<8x256xi1>
    %125 = vector.broadcast %cst_42 : f32 to vector<8x256xf32>
    %126 = arith.select %124, %122, %125 : vector<8x256xi1>, vector<8x256xf32>
    %c4 = arith.constant 4 : index
    %127 = memref.load %arg2[%c4] : memref<27xf32, #tpu.memory_space<smem>>
    %128 = vector.broadcast %127 : f32 to vector<8x256xf32>
    %129 = arith.mulf %128, %56 : vector<8x256xf32>
    %c13 = arith.constant 13 : index
    %130 = memref.load %arg2[%c13] : memref<27xf32, #tpu.memory_space<smem>>
    %131 = vector.broadcast %130 : f32 to vector<8x256xf32>
    %132 = arith.mulf %131, %30 : vector<8x256xf32>
    %133 = arith.addf %129, %132 : vector<8x256xf32>
    %c22 = arith.constant 22 : index
    %134 = memref.load %arg2[%c22] : memref<27xf32, #tpu.memory_space<smem>>
    %135 = vector.broadcast %134 : f32 to vector<8x256xf32>
    %136 = arith.mulf %135, %58 : vector<8x256xf32>
    %137 = arith.addf %133, %136 : vector<8x256xf32>
    %138 = arith.addf %126, %137 : vector<8x256xf32>
    %c5 = arith.constant 5 : index
    %139 = memref.load %arg2[%c5] : memref<27xf32, #tpu.memory_space<smem>>
    %140 = vector.broadcast %139 : f32 to vector<8x256xf32>
    %141 = arith.mulf %140, %56 : vector<8x256xf32>
    %c14 = arith.constant 14 : index
    %142 = memref.load %arg2[%c14] : memref<27xf32, #tpu.memory_space<smem>>
    %143 = vector.broadcast %142 : f32 to vector<8x256xf32>
    %144 = arith.mulf %143, %30 : vector<8x256xf32>
    %145 = arith.addf %141, %144 : vector<8x256xf32>
    %c23 = arith.constant 23 : index
    %146 = memref.load %arg2[%c23] : memref<27xf32, #tpu.memory_space<smem>>
    %147 = vector.broadcast %146 : f32 to vector<8x256xf32>
    %148 = arith.mulf %147, %58 : vector<8x256xf32>
    %149 = arith.addf %145, %148 : vector<8x256xf32>
    %c255_i32 = arith.constant 255 : i32
    %150 = tpu.dynamic_rotate %149 by %c255_i32 dim 1 : vector<8x256xf32>, i32 -> vector<8x256xf32>
    %cst_43 = arith.constant 0.000000e+00 : f32
    %151 = vector.shape_cast %28 : vector<1x256xi1> to vector<1x256xi1>
    %152 = vector.broadcast %151 : vector<1x256xi1> to vector<8x256xi1>
    %153 = vector.broadcast %cst_43 : f32 to vector<8x256xf32>
    %154 = arith.select %152, %150, %153 : vector<8x256xi1>, vector<8x256xf32>
    %155 = arith.addf %138, %154 : vector<8x256xf32>
    %c6 = arith.constant 6 : index
    %156 = memref.load %arg2[%c6] : memref<27xf32, #tpu.memory_space<smem>>
    %157 = vector.broadcast %156 : f32 to vector<8x256xf32>
    %158 = arith.mulf %157, %56 : vector<8x256xf32>
    %c15 = arith.constant 15 : index
    %159 = memref.load %arg2[%c15] : memref<27xf32, #tpu.memory_space<smem>>
    %160 = vector.broadcast %159 : f32 to vector<8x256xf32>
    %161 = arith.mulf %160, %30 : vector<8x256xf32>
    %162 = arith.addf %158, %161 : vector<8x256xf32>
    %c24 = arith.constant 24 : index
    %163 = memref.load %arg2[%c24] : memref<27xf32, #tpu.memory_space<smem>>
    %164 = vector.broadcast %163 : f32 to vector<8x256xf32>
    %165 = arith.mulf %164, %58 : vector<8x256xf32>
    %166 = arith.addf %162, %165 : vector<8x256xf32>
    %c241_i32 = arith.constant 241 : i32
    %167 = tpu.dynamic_rotate %166 by %c241_i32 dim 1 : vector<8x256xf32>, i32 -> vector<8x256xf32>
    %168 = arith.andi %24, %26 : vector<1x256xi1>
    %cst_44 = arith.constant 0.000000e+00 : f32
    %169 = vector.shape_cast %168 : vector<1x256xi1> to vector<1x256xi1>
    %170 = vector.broadcast %169 : vector<1x256xi1> to vector<8x256xi1>
    %171 = vector.broadcast %cst_44 : f32 to vector<8x256xf32>
    %172 = arith.select %170, %167, %171 : vector<8x256xi1>, vector<8x256xf32>
    %c7 = arith.constant 7 : index
    %173 = memref.load %arg2[%c7] : memref<27xf32, #tpu.memory_space<smem>>
    %174 = vector.broadcast %173 : f32 to vector<8x256xf32>
    %175 = arith.mulf %174, %56 : vector<8x256xf32>
    %c16 = arith.constant 16 : index
    %176 = memref.load %arg2[%c16] : memref<27xf32, #tpu.memory_space<smem>>
    %177 = vector.broadcast %176 : f32 to vector<8x256xf32>
    %178 = arith.mulf %177, %30 : vector<8x256xf32>
    %179 = arith.addf %175, %178 : vector<8x256xf32>
    %c25 = arith.constant 25 : index
    %180 = memref.load %arg2[%c25] : memref<27xf32, #tpu.memory_space<smem>>
    %181 = vector.broadcast %180 : f32 to vector<8x256xf32>
    %182 = arith.mulf %181, %58 : vector<8x256xf32>
    %183 = arith.addf %179, %182 : vector<8x256xf32>
    %c240_i32 = arith.constant 240 : i32
    %184 = tpu.dynamic_rotate %183 by %c240_i32 dim 1 : vector<8x256xf32>, i32 -> vector<8x256xf32>
    %cst_45 = arith.constant 0.000000e+00 : f32
    %185 = vector.shape_cast %24 : vector<1x256xi1> to vector<1x256xi1>
    %186 = vector.broadcast %185 : vector<1x256xi1> to vector<8x256xi1>
    %187 = vector.broadcast %cst_45 : f32 to vector<8x256xf32>
    %188 = arith.select %186, %184, %187 : vector<8x256xi1>, vector<8x256xf32>
    %189 = arith.addf %172, %188 : vector<8x256xf32>
    %c8 = arith.constant 8 : index
    %190 = memref.load %arg2[%c8] : memref<27xf32, #tpu.memory_space<smem>>
    %191 = vector.broadcast %190 : f32 to vector<8x256xf32>
    %192 = arith.mulf %191, %56 : vector<8x256xf32>
    %c17 = arith.constant 17 : index
    %193 = memref.load %arg2[%c17] : memref<27xf32, #tpu.memory_space<smem>>
    %194 = vector.broadcast %193 : f32 to vector<8x256xf32>
    %195 = arith.mulf %194, %30 : vector<8x256xf32>
    %196 = arith.addf %192, %195 : vector<8x256xf32>
    %c26 = arith.constant 26 : index
    %197 = memref.load %arg2[%c26] : memref<27xf32, #tpu.memory_space<smem>>
    %198 = vector.broadcast %197 : f32 to vector<8x256xf32>
    %199 = arith.mulf %198, %58 : vector<8x256xf32>
    %200 = arith.addf %196, %199 : vector<8x256xf32>
    %c239_i32 = arith.constant 239 : i32
    %201 = tpu.dynamic_rotate %200 by %c239_i32 dim 1 : vector<8x256xf32>, i32 -> vector<8x256xf32>
    %202 = arith.andi %24, %28 : vector<1x256xi1>
    %cst_46 = arith.constant 0.000000e+00 : f32
    %203 = vector.shape_cast %202 : vector<1x256xi1> to vector<1x256xi1>
    %204 = vector.broadcast %203 : vector<1x256xi1> to vector<8x256xi1>
    %205 = vector.broadcast %cst_46 : f32 to vector<8x256xf32>
    %206 = arith.select %204, %201, %205 : vector<8x256xi1>, vector<8x256xf32>
    %207 = arith.addf %189, %206 : vector<8x256xf32>
    %208 = arith.addf %110, %155 : vector<8x256xf32>
    %209 = arith.addf %208, %207 : vector<8x256xf32>
    %c0_47 = arith.constant 0 : index
    %210 = memref.load %arg3[%c0_47] : memref<2xf32, #tpu.memory_space<smem>>
    %211 = vector.broadcast %210 : f32 to vector<8x256xf32>
    %212 = arith.addf %209, %211 : vector<8x256xf32>
    %cst_48 = arith.constant 0.000000e+00 : f32
    %213 = vector.broadcast %cst_48 : f32 to vector<8x256xf32>
    %214 = arith.subf %213, %212 : vector<8x256xf32>
    %215 = math.exp %214 : vector<8x256xf32>
    %cst_49 = arith.constant 1.000000e+00 : f32
    %216 = vector.broadcast %cst_49 : f32 to vector<8x256xf32>
    %217 = arith.addf %216, %215 : vector<8x256xf32>
    %cst_50 = arith.constant 1.000000e+00 : f32
    %218 = vector.broadcast %cst_50 : f32 to vector<8x256xf32>
    %219 = arith.divf %218, %217 : vector<8x256xf32>
    %c1_51 = arith.constant 1 : index
    %220 = memref.load %arg3[%c1_51] : memref<2xf32, #tpu.memory_space<smem>>
    %221 = vector.broadcast %220 : f32 to vector<8x256xf32>
    %222 = arith.mulf %221, %219 : vector<8x256xf32>
    %223 = arith.mulf %222, %30 : vector<8x256xf32>
    %224 = arith.addf %223, %30 : vector<8x256xf32>
    %c0_52 = arith.constant 0 : index
    %c0_53 = arith.constant 0 : index
    %c0_54 = arith.constant 0 : index
    %225 = vector.load %arg7[%c0_52, %c0_53, %c0_54] : memref<1x8x256xf32, #tpu.memory_space<vmem>>, vector<1x8x256xf32>
    %226 = vector.shape_cast %225 : vector<1x8x256xf32> to vector<8x256xf32>
    %227 = vector.shape_cast %224 : vector<8x256xf32> to vector<1x8x256xf32>
    tpu.vector_store %arg7[%c0_52, %c0_53, %c0_54], %227 {strides = array<i32>} : memref<1x8x256xf32, #tpu.memory_space<vmem>>, vector<1x8x256xf32>,
    return
  }
  func.func @transform_0(%arg0: i32, %arg1: i32) -> i32 {
    %c0_i32 = arith.constant 0 : i32
    %c0_i32_0 = arith.constant 0 : i32
    return %c0_i32 : i32
  }
  func.func @transform_1(%arg0: i32, %arg1: i32) -> i32 {
    %c0_i32 = arith.constant 0 : i32
    %c0_i32_0 = arith.constant 0 : i32
    return %c0_i32 : i32
  }
  func.func @transform_2(%arg0: i32, %arg1: i32) -> (i32, i32) {
    %c0_i32 = arith.constant 0 : i32
    %c0_i32_0 = arith.constant 0 : i32
    %c0_i32_1 = arith.constant 0 : i32
    return %c0_i32, %c0_i32_0 : i32, i32
  }
  func.func @transform_4(%arg0: i32, %arg1: i32) -> (i32, i32, i32) {
    %c0_i32 = arith.constant 0 : i32
    %c0_i32_0 = arith.constant 0 : i32
    return %arg0, %arg1, %c0_i32 : i32, i32, i32
  }
  func.func @transform_5(%arg0: i32, %arg1: i32) -> (i32, i32, i32) {
    %c0_i32 = arith.constant 0 : i32
    %c0_i32_0 = arith.constant 0 : i32
    return %arg0, %arg1, %c0_i32 : i32, i32, i32
  }
}

</mosaic_0001>

<bundles_post_ra>
// kernel: tpu_custom_call.1
= control target key start
LH: loop header
LB: loop body
LE: loop exit
PB: predicated region body
PF: predicated region fallthrough
CT: control target
= control target key end

     0   :  { %s1908_s0 = inlined_call_operand.hbm [shape: f32[27], index: 0, kind: input, shape index: {}]   ;;  %s1909_s1 = inlined_call_operand.vmem [shape: f32[2], index: 1, kind: input, shape index: {}]   ;;  %s1910_s2 = inlined_call_operand.vmem [shape: s32[2,256], index: 2, kind: input, shape index: {}]   ;;  %s1911_s3 = inlined_call_operand.hbm [shape: f32[48,256], index: 3, kind: input, shape index: {}]   ;;  %s1912_s4 = inlined_call_operand.hbm [shape: f32[2,24,256], index: 4, kind: input, shape index: {}]   ;;  %s1913_s5 = inlined_call_operand.hbm [shape: f32[2,24,256], index: 5, kind: output, shape index: {}]  }
   0x1   :  { %1928 = sst [smem:[#allocation25_spill]] %s1908_s0 }
   0x2   :  { %1929 = sst [smem:[#allocation26_spill]] %s1909_s1 }
   0x3   :  { %1930 = sst [smem:[#allocation27_spill]] %s1910_s2 }
   0x4   :  { %1931 = sst [smem:[#allocation28_spill]] %s1912_s4 }
   0x5   :  { %10 = vsyncpa [#allocation7], 0 }
   0x6   :  { %11 = vsyncpa [#allocation8], 0 }
   0x7   :  { %12 = vsyncpa [#allocation5], 0 }
   0x8   :  { %14 = vsyncpa [#allocation5 + $0x1], 0 }
   0x9   :  { %15 = vsyncpa [#allocation6], 0 }
   0xa   :  { %17 = vsyncpa [#allocation6 + $0x1], 0  ;;  %s1297_s18 = smov 0   ;;  %s1299_s19 = smov 0  }
   0xb   :  { %s1301_s20 = smov 0   ;;  %s1303_s21 = smov 0  }
   0xc   :  { %s1305_s22 = smov 0   ;;  %s1307_s23 = smov 0  }
   0xd   :  { %s1309_s24 = smov 0   ;;  %s1311_s25 = smov 0  }
   0xe LB: > { %1932 = sst [smem:[#allocation20_spill]] %s1221_s18  ;;  %s857_s26 = sadd.s32 4294967295, %s1249_s25   ;;  %s1249_s25 = sphi %s1311_s25, %s23_s25   ;;  %s1245_s24 = sphi %s1309_s24, %s1979_s24   ;;  %s1241_s23 = sphi %s1307_s23, %s1984_s23   ;;  %s1237_s22 = sphi %s1305_s22, %s1977_s22   ;;  %s1233_s21 = sphi %s1303_s21, %s1983_s21   ;;  %s1229_s20 = sphi %s1301_s20, %s1982_s20   ;;  %s1225_s19 = sphi %s1299_s19, %s1981_s19   ;;  %s1221_s18 = sphi %s1297_s18, %s1980_s18  }
   0xf   : > { %1933 = sst [smem:[#allocation21_spill]] %s1245_s24  ;;  %s858_s27 = sadd.s32 4294967294, %s1249_s25  }
  0x10   : > { %p120_p0 = scmp.ne.s32.totalorder %s1225_s19, %s1221_s18  ;;  %p1341_p1 = scmp.eq.s32.totalorder %s857_s26, 0 }
  0x11   : > { %p1345_p2 = scmp.eq.s32.totalorder %s857_s26, 5  ;;  %p152_p3 = scmp.eq.s32.totalorder %s858_s27, 5 }
  0x12   : > { %s1934_s28 = scalar_select %p1341_p1, 1, 0 }
  0x13   : > { %p1351_p4 = por %p1341_p1, %p120_p0  ;;  %p859_p5 = scmp.ge.s32.totalorder %s1249_s25, 1 }
  0x14   : > { %p1356_p6 = por %p152_p3, %p120_p0  ;;  %p159_p7 = scmp.lt.s32.totalorder %s1249_s25, 7 }
  0x15   : > { %s1936_s30 = scalar_select %p1351_p4, 1, 0 }
  0x16   : > { %s1937_s6 = scalar_select %p1356_p6, 1, 0 }
  0x17   : > { %p1361_p8 = pnand %p859_p5, %p159_p7  ;;  %s1940_s1 = sld [smem:[#allocation26_spill]] }
  0x18   : > { %1938 = sst [smem:[#allocation22_spill]] %s1937_s6 }
  0x19   : > { %p926_p9 = pneg %p1361_p8  ;;  %s1942_s0 = sld [smem:[#allocation25_spill]] }
  0x1b   : > { %p1372_p10 = pnand %p926_p9, %p1341_p1 }
  0x1d   : > { %s181_s10 = sshll.u32 %s1940_s1, 4  ;;  %p1035_p12 = pneg %p1372_p10  ;;  %s182_s10 = int_to_ptr.vmem [resolvable:$true] %s181_s10 }
  0x1f   : > { %s1033_s14 = scalar_lea.hbm %s1942_s0, 16 }
  0x20   : > { %p1034_p11 = scmp.ne.s32.totalorder %s1942_s0, %s1033_s14  ;;  %p1040_p3 = scmp.lt.u32.totalorder %s1033_s14, %s1942_s0 }
  0x22   : > { %p1036_p13 = pnand %p1035_p12, %p1034_p11 }
  0x24   : > { %p1037_p0 = pneg %p1036_p13 }
  0x26   : > { %p1042_p5 = pnand %p1040_p3, %p1037_p0 }
  0x28   : > { %1045 = shalt.err (!%p1042_p5)
}
  0x29   : > { %s1251_s27 = smov [#allocation4]   ;;  %s1046_s12 = scalar_lea.vmem %s182_s10, 16 }
  0x2a   : > { %929 = dma.hbm_to_smem (!%p1372_p10), %s1942_s0, 16, %s1251_s27, [#allocation7]  }
  0x2b   : > { %p1047_p7 = scmp.ne.s32.totalorder %s182_s10, %s1046_s12  ;;  %p1054_p4 = scmp.lt.s32.totalorder %s182_s10, %s182_s10 }
  0x2c   : > { %p1055_p11 = scmp.lt.s32.totalorder %s1046_s12, %s1046_s12 }
  0x2d   : > { %p1049_p9 = pnand %p1047_p7, %p1035_p12 }
  0x2e   : > { %p1056_p13 = por %p1055_p11, %p1054_p4 }
  0x2f   : > { %p1050_p6 = pneg %p1049_p9 }
  0x31   : > { %p1057_p1 = pnand %p1056_p13, %p1050_p6 }
  0x33   : > { %1060 = shalt.err (!%p1057_p1)
}
  0x34   : > { %s1252_s13 = smov [#allocation9]   ;;  %s32_s14 = sadd.s32 1, %s1241_s23 }
  0x35   : > { %932 = dma.vmem_to_smem (!%p1372_p10), %s182_s10, 16, %s1252_s13, [#allocation8]  }
  0x36   : > { %s35_s15 = sadd.s32 1, %s1245_s24  ;;  %p33_p4 = scmp.ge.s32.totalorder %s32_s14, 3 }
  0x37   : > { %s107_s16 = sadd.s32 1, %s1229_s20  ;;  %p114_p1 = scmp.ne.s32.totalorder %s1229_s20, %s1225_s19 }
  0x38   : > { %p115_p6 = scmp.eq.s32.totalorder %s1249_s25, 0  ;;  %s1986_s14 = smov (%p33_p4, %s32_s14), 0 }
  0x39   : > { %1943 = sst [smem:[#allocation23_spill]] %s1986_s14  ;;  %s1988_s15 = smov (!%p33_p4, %s35_s15), %s1245_s24 }
  0x3a   : > { %s103_s11 = ssub.s32 %s1241_s23, %s1986_s14  ;;  %p1405_p12 = por %p115_p6, %p114_p1 }
  0x3b   : > { %p37_p10 = scmp.ge.s32.totalorder %s1988_s15, 2  ;;  %p1411_p0 = por %p1345_p2, %p114_p1 }
  0x3c   : > { %p943_p3 = scmp.lt.s32.totalorder %s1249_s25, 6  ;;  %s195_s26 = sand.u32 1, %s1229_s20  }
  0x3d   : > { %s1945_s10 = scalar_select %p1411_p0, 1, 0 }
  0x3e   : > { %s1990_s15 = smov (%p37_p10, %s1988_s15), 0  ;;  %s863_s27 = sshll.u32 %s195_s26, 4 }
  0x3f   : > { %1946 = sst [smem:[#allocation24_spill]] %s1990_s15  ;;  %s102_s8 = ssub.s32 %s1245_s24, %s1990_s15 }
  0x40   : > { %s104_s9 = sor.u32 %s103_s11, %s102_s8  ;;  %s864_s12 = sshll.u32 %s1241_s23, 1 }
  0x41   : > { %p105_p5 = scmp.eq.s32.totalorder %s104_s9, 0  ;;  %s912_s13 = smul.u32 6, %s1245_s24 }
  0x42   : > { %s199_s0 = scalar_lea.vmem [#allocation10], %s863_s27  ;;  %p1425_p7 = pnand %p943_p3, %p1405_p12 }
  0x43   : > { %s209_s1 = sshll.u32 %s199_s0, 4  ;;  %s205_s6 = sadd.s32 %s912_s13, %s864_s12  ;;  %s1432_s1 = int_to_ptr.vmem [resolvable:$true] %s209_s1 }
  0x44   : > { %s1430_s14 = scalar_select %p105_p5, %s1229_s20, %s107_s16  }
  0x45   : > { %s865_s18 = sshll.u32 %s205_s6, 7  ;;  %s1948_s4 = sld [smem:[#allocation28_spill]] }
  0x46   : > { %s196_s0 = scalar_lea.sflag [#allocation5], %s195_s26  ;;  %p1063_p9 = pneg %p1425_p7 }
  0x4b   : > { %s1437_s8 = scalar_lea.hbm %s1948_s4, %s865_s18  ;;  %s1066_s27 = scalar_lea.hbm %s1948_s4, 1536 }
  0x4c   : > { %s1061_s17 = scalar_lea.hbm %s1437_s8, 256  ;;  %p1067_p4 = scmp.lt.u32.totalorder %s1437_s8, %s1948_s4 }
  0x4d   : > { %p1062_p2 = scmp.ne.s32.totalorder %s1437_s8, %s1061_s17  ;;  %p1068_p1 = scmp.lt.u32.totalorder %s1066_s27, %s1061_s17 }
  0x4e   : > { %p1070_p12 = scmp.lt.u32.totalorder %s1061_s17, %s1437_s8 }
  0x4f   : > { %p1064_p11 = pnand %p1063_p9, %p1062_p2  ;;  %p1069_p6 = por %p1068_p1, %p1067_p4 }
  0x51   : > { %p1065_p13 = pneg %p1064_p11  ;;  %p1071_p10 = por %p1070_p12, %p1069_p6 }
  0x53   : > { %p1072_p3 = pnand %p1071_p10, %p1065_p13 }
  0x55   : > { %1075 = shalt.err (!%p1072_p3)
}
  0x56   : > { %s1076_s26 = scalar_lea.vmem %s1432_s1, 256  ;;  %s1253_s9 = smov [#allocation10]  }
  0x57   : > { %p1077_p5 = scmp.ne.s32.totalorder %s1432_s1, %s1076_s26  ;;  %s1081_s12 = sshll.u32 %s1253_s9, 4  ;;  %s1082_s12 = int_to_ptr.vmem [resolvable:$false] %s1081_s12 }
  0x58   : > { %s1083_s13 = scalar_lea.vmem %s1082_s12, 512  ;;  %p1084_p0 = scmp.lt.s32.totalorder %s1432_s1, %s1082_s12 }
  0x59   : > { %p1079_p2 = pnand %p1077_p5, %p1063_p9  ;;  %p1085_p4 = scmp.lt.s32.totalorder %s1083_s13, %s1076_s26 }
  0x5b   : > { %p1080_p11 = pneg %p1079_p2  ;;  %p1086_p1 = por %p1085_p4, %p1084_p0 }
  0x5d   : > { %p1087_p6 = pnand %p1086_p1, %p1080_p11 }
  0x5f   : > { %1090 = shalt.err (!%p1087_p6)
}
  0x60   : > { %936 = dma.hbm_to_vmem [thread:$0]  (!%p1425_p7), %s1437_s8, 256, %s1432_s1, %s196_s0  }
  0x61   : > { %218 = sbr.rel (%p1361_p8) target bundleno = 399 (0x18f), region = 36  ;;  %p1949_p9 = scmp.ne.s32.totalorder (!%p1361_p8), %s1934_s28, 0 }
  0x68   : > { %1200 = dma.done.wait (%p1949_p9), [#allocation7], 16  }
  0x69   : > { %1202 = vsyncadd (%p1949_p9), [#allocation7], 4294967280 }
  0x6a   : > { %1204 = dma.done.wait (%p1949_p9), [#allocation8], 16  }
  0x6b   : > { %1206 = vsyncadd (%p1949_p9), [#allocation8], 4294967280  ;;  %s1475_s29 = sand.u32 1, %s1225_s19   ;;  %p1950_p8 = scmp.ne.s32.totalorder %s1936_s30, 0 }
  0x6c   : > { %s1922_s1 = sshll.u32 %s1475_s29, 4  ;;  %s229_s7 = scalar_lea.sflag [#allocation5], %s1475_s29 }
  0x6d   : > { %s232_s11 = scalar_lea.vmem [#allocation10], %s1922_s1 }
  0x6e   : > { %1208 = dma.done.wait (%p1950_p8), %s229_s7, 256  }
  0x6f   : > { %1210 = vsyncadd (%p1950_p8), %s229_s7, 4294967040 }
  0x70   : > { %237 = sfence }
  0x71   : > { %s1951_s2 = sld [smem:[#allocation27_spill]]  ;;  %v1490_v1 = vld [vmem:[%s232_s11] sm:$0xff]  ;;  %s871_s0 = sshll.u32 %s1233_s21, 3  ;;  %v1503_v3 = vld [vmem:[%s232_s11 + $0x8] sm:$0xff] }
  0x72   : > { %s1923_s30 = smul.u32 24, %s1237_s22  ;;  %s872_s6 = sadd.s32 4294967295, %s871_s0 }
  0x73   : > { %p261_p0 = scmp.gt.s32.totalorder %s872_s6, 0  ;;  %s1505_s27 = sadd.s32 8, %s871_s0 }
  0x74   : > { %s1254_s15 = smov [#allocation2]   ;;  %p265_p7 = scmp.lt.s32.totalorder %s1505_s27, 23 }
  0x75   : > { %s275_s18 = sshll.u32 %s1254_s15, 4  ;;  %s1992_s6 = smov (!%p261_p0, %s872_s6), 0  ;;  %s1510_s18 = int_to_ptr.vmem [resolvable:$true] %s275_s18 }
  0x76   : > { %s263_s26 = sadd.s32 %s1992_s6, %s1923_s30  ;;  %s1925_s15 = scalar_lea.hbm %s1911_s3, 1536 }
  0x77   : > { %v1488_v0 = vld [vmem:[%s1951_s2] ss:$2 sm:$0x3]  ;;  %v1496_v2 = vld [vmem:[%s1951_s2 + $0x1] ss:$2 sm:$0x3] }
  0x78   : > { %vm295_vm0 = vcmp.ge.s32.totalorder %v1488_v0, 1  ;;  %vm296_vm1 = vcmp.le.s32.totalorder %v1488_v0, 14  ;;  %vm297_vm2 = vcmp.ge.s32.totalorder %v1496_v2, 1  ;;  %vm298_vm3 = vcmp.le.s32.totalorder %v1496_v2, 14  ;;  %s268_s9 = sshrl.u32 %s263_s26, 3  ;;  %s269_s12 = sand.u32 7, %s263_s26  }
  0x79   : > { %s873_s13 = sshll.u32 %s268_s9, 4 }
  0x7a   : > { %s271_s7 = sadd.s32 %s873_s13, %s269_s12 }
  0x7b   : > { %s874_s8 = sshll.u32 %s271_s7, 4 }
  0x7c   : > { %s273_s17 = scalar_lea.hbm %s1911_s3, %s874_s8 }
  0x7d   : > { %s1091_s0 = scalar_lea.hbm %s273_s17, 32  ;;  %p1094_p12 = scmp.lt.u32.totalorder %s273_s17, %s1911_s3 }
  0x7e   : > { %p1092_p13 = scmp.ne.s32.totalorder %s273_s17, %s1091_s0  ;;  %p1095_p10 = scmp.lt.u32.totalorder %s1925_s15, %s1091_s0 }
  0x7f   : > { %p1097_p5 = scmp.lt.u32.totalorder %s1091_s0, %s273_s17 }
  0x80   : > { %p1096_p3 = por %p1095_p10, %p1094_p12 }
  0x82   : > { %p1098_p2 = por %p1097_p5, %p1096_p3 }
  0x84   : > { %p1099_p11 = pnand %p1098_p2, %p1092_p13 }
  0x86   : > { %1102 = shalt.err (!%p1099_p11)  }
  0x87   : > { %s1103_s1 = scalar_lea.vmem %s1510_s18, 32  ;;  %s1924_s26 = scalar_lea.vmem %s1510_s18, 64 }
  0x88   : > { %p1104_p4 = scmp.ne.s32.totalorder %s1510_s18, %s1103_s1  ;;  %p1108_p1 = scmp.lt.s32.totalorder %s1510_s18, %s1510_s18 }
  0x89   : > { %p1109_p6 = scmp.lt.s32.totalorder %s1924_s26, %s1103_s1 }
  0x8b   : > { %p1110_p9 = por %p1109_p6, %p1108_p1 }
  0x8d   : > { %p1111_p8 = pnand %p1110_p9, %p1104_p4 }
  0x8f   : > { %1114 = shalt.err (!%p1111_p8)  }
  0x90   : > { %s1927_s2 = smov 128   ;;  %s1256_s4 = smov 16  }
  0x91   : > { %s1257_s30 = smov 1   ;;  %s1994_s27 = smov (!%p265_p7, %s1505_s27), 23 }
  0x92   : > { %278 = dma.hbm_to_vmem [thread:$0]  %s273_s17, 32, %s1510_s18, [#allocation3], %s1927_s2, %s1256_s4, %s1257_s30 }
  0x93   : > { %s1952_s9 = smul.u32 24, %s1237_s22  ;;  %s1258_s13 = smov [#allocation2 + $0x2]  }
  0x94   : > { %s288_s7 = sshll.u32 %s1258_s13, 4  ;;  %s289_s7 = int_to_ptr.vmem [resolvable:$true] %s288_s7 }
  0x95   : > { %s267_s12 = sadd.s32 %s1994_s27, %s1952_s9  ;;  %s1953_s9 = scalar_lea.hbm %s1911_s3, 1536 }
  0x96   : > { %s279_s8 = sshrl.u32 %s267_s12, 3  ;;  %s280_s28 = sand.u32 7, %s267_s12  }
  0x97   : > { %s875_s11 = sshll.u32 %s279_s8, 4 }
  0x98   : > { %s282_s0 = sadd.s32 %s875_s11, %s280_s28 }
  0x99   : > { %s876_s16 = sshll.u32 %s282_s0, 4 }
  0x9a   : > { %s284_s26 = scalar_lea.hbm %s1911_s3, %s876_s16 }
  0x9b   : > { %s1115_s15 = scalar_lea.hbm %s284_s26, 32  ;;  %p1118_p7 = scmp.lt.u32.totalorder %s284_s26, %s1911_s3 }
  0x9c   : > { %p1116_p0 = scmp.ne.s32.totalorder %s284_s26, %s1115_s15  ;;  %p1119_p13 = scmp.lt.u32.totalorder %s1953_s9, %s1115_s15 }
  0x9d   : > { %p1121_p10 = scmp.lt.u32.totalorder %s1115_s15, %s284_s26 }
  0x9e   : > { %p1120_p12 = por %p1119_p13, %p1118_p7 }
  0xa0   : > { %p1122_p3 = por %p1121_p10, %p1120_p12 }
  0xa2   : > { %p1123_p5 = pnand %p1122_p3, %p1116_p0 }
  0xa4   : > { %1126 = shalt.err (!%p1123_p5)  }
  0xa5   : > { %s1127_s12 = scalar_lea.vmem %s289_s7, 32  ;;  %p1132_p11 = scmp.lt.s32.totalorder %s289_s7, %s1510_s18 }
  0xa6   : > { %p1128_p2 = scmp.ne.s32.totalorder %s289_s7, %s1127_s12  ;;  %s1954_s13 = scalar_lea.vmem %s1510_s18, 64 }
  0xa7   : > { %p1133_p4 = scmp.lt.s32.totalorder %s1954_s13, %s1127_s12 }
  0xa9   : > { %p1134_p1 = por %p1133_p4, %p1132_p11 }
  0xab   : > { %p1135_p6 = pnand %p1134_p1, %p1128_p2 }
  0xad   : > { %1138 = shalt.err (!%p1135_p6)  }
  0xae   : > { %s1955_s24 = smov 128   ;;  %s1956_s2 = sshll.u32 %s1475_s29, 4 }
  0xaf   : > { %291 = dma.hbm_to_vmem [thread:$0]  %s284_s26, 32, %s289_s7, [#allocation3 + $0x1], %s1955_s24, %s1256_s4, %s1257_s30 }
  0xb0   : > { %s1559_s15 = scalar_lea.vmem [#allocation11], %s1956_s2 }
  0xb1   : > { %1211 = dma.done.wait [#allocation3], 32 }
  0xb2   : > { %1212 = vsyncadd [#allocation3], 4294967264 }
  0xb3   : > { %1213 = dma.done.wait [#allocation3 + $0x1], 32 }
  0xb4   : > { %1214 = vsyncadd [#allocation3 + $0x1], 4294967264  ;;  %p306_p9 = scmp.gt.s32.totalorder %s1233_s21, 0  ;;  %p309_p8 = scmp.lt.s32.totalorder %s1233_s21, 2  ;;  %v319_v4 = vlaneseq  ;;  %v312_v9 = vld [vmem:[#allocation2] sm:$0x3] }
  0xb5   : > { %s1563_s18 = sld [smem:[#allocation4 + $0x1]]  ;;  %s1565_s8 = sld [smem:[#allocation4 + $0xa]]  ;;  %v315_v10 = vld [vmem:[#allocation2 + $0x2] sm:$0x3]  ;;  %v331_v12 = vrot.slane %v1490_v1, 7  ;;  %v338_v13 = vrot.slane %v1490_v1, 1  ;;  %vm381_vm6 = vmand %vm295_vm0, %vm297_vm2 }
  0xb6   : > { %s307_s28 = scalar_select %p306_p9, 1, 0  ;;  %v320_v5 = vshrl.u32 %v319_v4, 7  ;;  %v332_v17 = vrot.slane %v1503_v3, 7  ;;  %vm335_vm4 = vcmask 1040384   ;;  %vm353_vm5 = vcmask 1046528   ;;  %vm456_vm8 = vmand %vm295_vm0, %vm298_vm3 }
  0xb7   : > { %s310_s26 = scalar_select %p309_p8, 1, 0  ;;  %v339_v19 = vrot.slane %v1503_v3, 1 }
  0xb8   : > { %s308_s7 = scvt.s32.f32 %s307_s28  ;;  %s1568_s11 = sld [smem:[#allocation4 + $0x13]]  ;;  %v1572_v7 = vsub.s32 0, %v320_v5  ;;  %v1574_v8 = vsub.s32 1, %v320_v5 }
  0xb9   : > { %s311_s0 = scvt.s32.f32 %s310_s26  ;;  %s1570_s16 = sld [smem:[#allocation4]] }
  0xba   : > { %v313_v6 = vstv %s308_s7  ;;  %s1576_s6 = sld [smem:[#allocation4 + $0x9]]  ;;  %s1578_s1 = sld [smem:[#allocation4 + $0x12]] }
  0xbb   : > { %v316_v11 = vstv %s311_s0  ;;  %v314_v14 = vmul.f32 %v313_v6, %v312_v9  ;;  %v400_v16 = vstv %s1565_s8  ;;  %s1584_s17 = sld [smem:[#allocation4 + $0x3]]  ;;  %v396_v18 = vstv %s1563_s18  ;;  %s1588_s27 = sld [smem:[#allocation4 + $0xc]] }
  0xbc   : > { %v317_v15 = vmul.f32 %v316_v11, %v315_v10  ;;  %s1594_s9 = sld [smem:[#allocation4 + $0x15]]  ;;  %v401_v24 = vmul.f32 %v400_v16, %v1490_v1  ;;  %v402_v27 = vmul.f32 %v400_v16, %v1503_v3  ;;  %s1610_s12 = sld [smem:[#allocation4 + $0x2]] }
  0xbd   : > { %v322_v20 = vrot.slane %v314_v14, %v1572_v7  ;;  %v326_v23 = vrot.slane %v314_v14, %v1574_v8  ;;  %s1612_s13 = sld [smem:[#allocation4 + $0xb]]  ;;  %s1620_s24 = sld [smem:[#allocation4 + $0x14]] }
  0xbe   : > { %v346_v21 = vrot.slane %v317_v15, %v1572_v7  ;;  %v406_v22 = vstv %s1568_s11  ;;  %v350_v25 = vrot.slane %v317_v15, %v1574_v8  ;;  %s1629_s2 = sld [smem:[#allocation4 + $0x5]]  ;;  %s1633_s18 = sld [smem:[#allocation4 + $0xe]] }
  0xbf   : > { %v357_v26 = vstv %s1570_s16  ;;  %v1601_v28 = vsel %vm335_vm4, %v322_v20, %v331_v12  ;;  %v1607_v30 = vsel %vm335_vm4, %v326_v23, %v332_v17  ;;  %s1635_s8 = sld [smem:[#allocation4 + $0x17]]  ;;  %s1641_s28 = sld [smem:[#allocation4 + $0x6]]  ;;  %vm587_vm4 = vmand %vm296_vm1, %vm297_vm2 }
  0xc0   : > { %v1604_v29 = vsel %vm353_vm5, %v338_v13, %v346_v21  ;;  %v361_v31 = vstv %s1576_s6  ;;  %v397_v32 = vmul.f32 %v396_v18, %v1601_v28  ;;  %v1617_v34 = vsel %vm353_vm5, %v339_v19, %v350_v25  ;;  %s1647_s26 = sld [smem:[#allocation4 + $0xf]]  ;;  %s1649_s7 = sld [smem:[#allocation4 + $0x18]] }
  0xc1   : > { %v407_v33 = vmul.f32 %v406_v22, %v1604_v29  ;;  %v358_v35 = vmul.f32 %v357_v26, %v1601_v28  ;;  %v359_v36 = vmul.f32 %v357_v26, %v1607_v30  ;;  %v362_v37 = vmul.f32 %v361_v31, %v1490_v1  ;;  %s1259_s11 = smov 17   ;;  %s1657_s0 = sld [smem:[#allocation4 + $0x7]] }
  0xc2   : > { %v363_v38 = vmul.f32 %v361_v31, %v1503_v3  ;;  %v367_v39 = vstv %s1578_s1  ;;  %v403_v40 = vadd.f32 %v401_v24, %v397_v32  ;;  %v398_v43 = vmul.f32 %v396_v18, %v1607_v30  ;;  %s1662_s16 = sld [smem:[#allocation4 + $0x10]]  ;;  %s1670_s6 = sld [smem:[#allocation4 + $0x19]] }
  0xc3   : > { %v368_v41 = vmul.f32 %v367_v39, %v1604_v29  ;;  %v369_v42 = vmul.f32 %v367_v39, %v1617_v34  ;;  %v364_v44 = vadd.f32 %v362_v37, %v358_v35  ;;  %v408_v45 = vmul.f32 %v406_v22, %v1617_v34  ;;  %s1676_s1 = sld [smem:[#allocation4 + $0x11]]  ;;  %p1973_p7 = scmp.ne.s32.totalorder %s1945_s10, 0 }
  0xc4   : > { %v365_v46 = vadd.f32 %v363_v38, %v359_v36  ;;  %v473_v47 = vstv %s1584_s17  ;;  %v409_v48 = vadd.f32 %v407_v33, %v403_v40  ;;  %v404_v49 = vadd.f32 %v402_v27, %v398_v43  ;;  %s1686_s17 = sld [smem:[#allocation4 + $0x1a]] }
  0xc5   : > { %v475_v50 = vmul.f32 %v473_v47, %v1607_v30  ;;  %v477_v51 = vstv %s1588_s27  ;;  %v370_v52 = vadd.f32 %v368_v41, %v364_v44  ;;  %v483_v55 = vstv %s1594_s9  ;;  %s1260_s27 = smov 15   ;;  %s1700_s9 = sld [smem:[#allocation4 + $0xd]] }
  0xc6   : > { %v371_v53 = vadd.f32 %v369_v42, %v365_v46  ;;  %v479_v54 = vmul.f32 %v477_v51, %v1503_v3  ;;  %411 = vrot.lane.b32.xlu1 %v409_v48, %s1256_s4  ;;  %v410_v56 = vadd.f32 %v408_v45, %v404_v49  ;;  %v485_v57 = vmul.f32 %v483_v55, %v1617_v34 }
  0xc7   : > { %v474_v58 = vmul.f32 %v473_v47, %v1601_v28  ;;  %v478_v59 = vmul.f32 %v477_v51, %v1490_v1  ;;  %372 = vrot.lane.b32.xlu0 %v370_v52, %s1259_s11  ;;  %v484_v61 = vmul.f32 %v483_v55, %v1604_v29  ;;  %v434_v62 = vstv %s1610_s12  ;;  %s1709_s12 = sld [smem:[#allocation4 + $0x16]] }
  0xc8   : > { %v481_v60 = vadd.f32 %v479_v54, %v475_v50  ;;  %v438_v63 = vstv %s1612_s13  ;;  %v436_v6 = vmul.f32 %v434_v62, %v1607_v30  ;;  %v444_v10 = vstv %s1620_s24  ;;  %s1261_s13 = smov 127   ;;  %s1262_s24 = smov 113  }
  0xc9   : > { %v480_v5 = vadd.f32 %v478_v59, %v474_v58  ;;  %v440_v9 = vmul.f32 %v438_v63, %v1503_v3  ;;  %v446_v12 = vmul.f32 %v444_v10, %v1617_v34  ;;  %v435_v13 = vmul.f32 %v434_v62, %v1601_v28 }
  0xca   : > { %v487_v11 = vadd.f32 %v485_v57, %v481_v60  ;;  %v439_v14 = vmul.f32 %v438_v63, %v1490_v1  ;;  %413 = vrot.lane.b32.xlu1 %v410_v56, %s1256_s4  ;;  %v445_v17 = vmul.f32 %v444_v10, %v1604_v29  ;;  %v527_v18 = vstv %s1629_s2  ;;  %s1674_s4 = sld [smem:[#allocation4 + $0x8]]  ;;  %s1263_s2 = smov 112  }
  0xcb   : > { %v486_v15 = vadd.f32 %v484_v61, %v480_v5  ;;  %v442_v16 = vadd.f32 %v440_v9, %v436_v6  ;;  %374 = vrot.lane.b32.xlu0 %v371_v53, %s1259_s11  ;;  %v529_v20 = vmul.f32 %v527_v18, %v1607_v30  ;;  %v531_v21 = vstv %s1633_s18  ;;  %s1264_s18 = smov 111  }
  0xcc   : > { %v441_v19 = vadd.f32 %v439_v14, %v435_v13  ;;  %v537_v22 = vstv %s1635_s8  ;;  %v533_v24 = vmul.f32 %v531_v21, %v1503_v3  ;;  %v528_v25 = vmul.f32 %v527_v18, %v1601_v28  ;;  %s682_s8 = sld [smem:[#allocation9]] }
  0xcd   : > { %v448_v23 = vadd.f32 %v446_v12, %v442_v16  ;;  %v539_v26 = vmul.f32 %v537_v22, %v1617_v34  ;;  %v532_v27 = vmul.f32 %v531_v21, %v1490_v1  ;;  %v538_v31 = vmul.f32 %v537_v22, %v1604_v29 }
  0xce   : > { %v565_v32 = vstv %s1641_s28  ;;  %490 = vrot.lane.b32.xlu1 %v487_v11, %s1257_s30  ;;  %v535_v33 = vadd.f32 %v533_v24, %v529_v20  ;;  %v569_v36 = vstv %s1647_s26  ;;  %v575_v37 = vstv %s1649_s7  ;;  %s904_s28 = sld [smem:[#allocation9 + $0x1]]  ;;  %s913_s26 = smul.u32 6, %s1237_s22 }
  0xcf   : > { %v567_v35 = vmul.f32 %v565_v32, %v1607_v30  ;;  %488 = vrot.lane.b32.xlu0 %v486_v15, %s1257_s30  ;;  %v447_v38 = vadd.f32 %v445_v17, %v441_v19  ;;  %v534_v39 = vadd.f32 %v532_v27, %v528_v25  ;;  %v571_v40 = vmul.f32 %v569_v36, %v1503_v3  ;;  %s1698_s30 = sld [smem:[#allocation4 + $0x4]]  ;;  %s906_s7 = sshll.u32 %s1233_s21, 1 }
  0xd0   : > { %v566_v41 = vmul.f32 %v565_v32, %v1601_v28  ;;  %v570_v42 = vmul.f32 %v569_v36, %v1490_v1  ;;  %v602_v43 = vstv %s1657_s0  ;;  %v541_v44 = vadd.f32 %v539_v26, %v535_v33  ;;  %s721_s11 = sadd.s32 %s913_s26, %s906_s7 }
  0xd1   : > { %v573_v45 = vadd.f32 %v571_v40, %v567_v35  ;;  %v577_v46 = vmul.f32 %v575_v37, %v1617_v34  ;;  %v606_v47 = vstv %s1662_s16  ;;  %v540_v48 = vadd.f32 %v538_v31, %v534_v39  ;;  %s907_s0 = sshll.u32 %s721_s11, 7  ;;  %s725_s16 = sshll.u32 %s1559_s15, 4  ;;  %s1854_s16 = int_to_ptr.vmem [resolvable:$true] %s725_s16 }
  0xd2   : > { %451 = vrot.lane.b32.xlu1 %v448_v23, %s1260_s27  ;;  %v576_v49 = vmul.f32 %v575_v37, %v1604_v29  ;;  %v604_v50 = vmul.f32 %v602_v43, %v1607_v30  ;;  %v608_v51 = vmul.f32 %v606_v47, %v1503_v3  ;;  %v572_v52 = vadd.f32 %v570_v42, %v566_v41 }
  0xd3   : > { %449 = vrot.lane.b32.xlu0 %v447_v38, %s1260_s27  ;;  %v612_v53 = vstv %s1670_s6  ;;  %v603_v54 = vmul.f32 %v602_v43, %v1601_v28  ;;  %v607_v55 = vmul.f32 %v606_v47, %v1490_v1  ;;  %v640_v56 = vstv %s1674_s4  ;;  %s1852_s6 = scalar_lea.hbm %s1913_s5, %s907_s0  ;;  %s709_s4 = scalar_lea.sflag [#allocation6], %s1475_s29 }
  0xd4   : > { %v644_v57 = vstv %s1676_s1  ;;  %v579_v58 = vadd.f32 %v577_v46, %v573_v45  ;;  %v642_v59 = vmul.f32 %v640_v56, %v1607_v30  ;;  %v610_v61 = vadd.f32 %v608_v51, %v604_v50  ;;  %s1139_s1 = scalar_lea.vmem %s1854_s16, 256 }
  0xd5   : > { %v646_v60 = vmul.f32 %v644_v57, %v1503_v3  ;;  %v614_v62 = vmul.f32 %v612_v53, %v1617_v34  ;;  %v613_v63 = vmul.f32 %v612_v53, %v1604_v29  ;;  %v650_v5 = vstv %s1686_s17  ;;  %p1140_p0 = scmp.ne.s32.totalorder %s1854_s16, %s1139_s1  ;;  %s1266_s17 = smov [#allocation11]  }
  0xd6   : > { %544 = vrot.lane.b32.xlu1 %v541_v44, %s1261_s13  ;;  %v578_v6 = vadd.f32 %v576_v49, %v572_v52  ;;  %v609_v9 = vadd.f32 %v607_v55, %v603_v54  ;;  %v641_v10 = vmul.f32 %v640_v56, %v1601_v28  ;;  %v645_v11 = vmul.f32 %v644_v57, %v1490_v1  ;;  %s1143_s27 = sshll.u32 %s1266_s17, 4  ;;  %s1144_s27 = int_to_ptr.vmem [resolvable:$false] %s1143_s27 }
  0xd7   : > { %542 = vrot.lane.b32.xlu0 %v540_v48, %s1261_s13  ;;  %v648_v12 = vadd.f32 %v646_v60, %v642_v59  ;;  %v652_v13 = vmul.f32 %v650_v5, %v1617_v34  ;;  %v616_v14 = vadd.f32 %v614_v62, %v610_v61  ;;  %v509_v15 = vstv %s1698_s30  ;;  %p1141_p13 = pnand %p1140_p0, %p1973_p7  ;;  %s1145_s30 = scalar_lea.vmem %s1144_s27, 512 }
  0xd8   : > { %v513_v16 = vstv %s1700_s9  ;;  %v615_v17 = vadd.f32 %v613_v63, %v609_v9  ;;  %v647_v18 = vadd.f32 %v645_v11, %v641_v10  ;;  %v651_v19 = vmul.f32 %v650_v5, %v1604_v29  ;;  %p1146_p10 = scmp.lt.s32.totalorder %s1854_s16, %s1144_s27  ;;  %p1147_p3 = scmp.lt.s32.totalorder %s1145_s30, %s1139_s1 }
  0xd9   : > { %v510_v20 = vmul.f32 %v509_v15, %v1601_v28  ;;  %v511_v21 = vmul.f32 %v509_v15, %v1607_v30  ;;  %v514_v22 = vmul.f32 %v513_v16, %v1490_v1  ;;  %v515_v23 = vmul.f32 %v513_v16, %v1503_v3  ;;  %p1142_p12 = pneg %p1141_p13 }
  0xda   : > { %582 = vrot.lane.b32.xlu1 %v579_v58, %s1262_s24  ;;  %v654_v24 = vadd.f32 %v652_v13, %v648_v12  ;;  %v519_v25 = vstv %s1709_s12  ;;  %v653_v33 = vadd.f32 %v651_v19, %v647_v18  ;;  %v1265_v30 = vmov 0   ;;  %p1148_p5 = por %p1147_p3, %p1146_p10 }
  0xdb   : > { %580 = vrot.lane.b32.xlu0 %v578_v6, %s1262_s24  ;;  %v516_v26 = vadd.f32 %v514_v22, %v510_v20  ;;  %v517_v27 = vadd.f32 %v515_v23, %v511_v21  ;;  %v520_v31 = vmul.f32 %v519_v25, %v1604_v29  ;;  %v521_v32 = vmul.f32 %v519_v25, %v1617_v34 }
  0xdc   : > { %v418_v36 = vsel %vm295_vm0, 1, %v1265_v30  ;;  %v382_v29 = vsel %vm381_vm6, 1, %v1265_v30  ;;  %v1736_v34 = vand.u32 127, %v319_v4  ;;  %v495_v37 = vsel %vm297_vm2, 1, %v1265_v30  ;;  %p1149_p2 = pnand %p1148_p5, %p1142_p12 }
  0xdd   : > { %v522_v35 = vadd.f32 %v520_v31, %v516_v26  ;;  %v523_v28 = vadd.f32 %v521_v32, %v517_v27  ;;  %v422_v38 = vrot.slane %v418_v36, %v1572_v7  ;;  %v426_v39 = vrot.slane %v418_v36, %v1574_v8 }
  0xde   : > { %619 = vrot.lane.b32.xlu1 %v616_v14, %s1263_s2  ;;  %v386_v41 = vrot.slane %v382_v29, %v1572_v7  ;;  %v390_v42 = vrot.slane %v382_v29, %v1574_v8  ;;  %v499_v44 = vrot.slane %v495_v37, %v1572_v7  ;;  %vm415_vm7 = vcmp.lt.s32.totalorder %v1736_v34, 16 }
  0xdf   : > { %617 = vrot.lane.b32.xlu0 %v615_v17, %s1263_s2  ;;  %vm1751_vm9 = vcmp.eq.s32.totalorder %v422_v38, 1  ;;  %vm1755_vm10 = vcmp.eq.s32.totalorder %v426_v39, 1  ;;  %vm378_vm11 = vcmp.lt.s32.totalorder %v1736_v34, 17  ;;  %v503_v46 = vrot.slane %v495_v37, %v1574_v8 }
  0xe0   : > { %vm1761_vm12 = vcmp.eq.s32.totalorder %v386_v41, 1  ;;  %vm1765_vm13 = vcmp.eq.s32.totalorder %v390_v42, 1  ;;  %vm492_vm14 = vcmp.lt.s32.totalorder %v1736_v34, 1  ;;  %vm1770_vm15 = vcmp.eq.s32.totalorder %v499_v44, 1 }
  0xe1   : > { %v457_v54 = vsel %vm456_vm8, 1, %v1265_v30  ;;  %vm1783_vm0 = vcmp.eq.s32.totalorder %v503_v46, 1  ;;  %v549_v62 = vsel %vm298_vm3, 1, %v1265_v30  ;;  %vm453_vm5 = vcmp.lt.s32.totalorder %v1736_v34, 15 }
  0xe2   : > { %657 = vrot.lane.b32.xlu1 %v654_v24, %s1264_s18  ;;  %v461_v9 = vrot.slane %v457_v54, %v1572_v7  ;;  %v465_v10 = vrot.slane %v457_v54, %v1574_v8  ;;  %v553_v14 = vrot.slane %v549_v62, %v1572_v7  ;;  %v557_v17 = vrot.slane %v549_v62, %v1574_v8 }
  0xe3   : > { %655 = vrot.lane.b32.xlu0 %v653_v33, %s1264_s18  ;;  %v588_v18 = vsel %vm587_vm4, 1, %v1265_v30 }
  0xe4   : > { %vm466_vm2 = vcmp.eq.s32.totalorder %v461_v9, 1  ;;  %vm467_vm6 = vcmp.eq.s32.totalorder %v465_v10, 1  ;;  %v592_v27 = vrot.slane %v588_v18, %v1572_v7  ;;  %v596_v31 = vrot.slane %v588_v18, %v1574_v8 }
  0xe5   : > { %vm558_vm8 = vcmp.eq.s32.totalorder %v553_v14, 1  ;;  %v683_v10 = vstv %s682_s8 }
 0x138   : > { %v412_v40 = vpop.permute.xlu1 %411 }
 0x139   : > { %v373_v43 = vpop.permute.xlu0 %372 }
 0x13c   : > { %v414_v47 = vpop.permute.xlu1 %413 }
 0x13d   : > { %v416_v50 = vsel %vm415_vm7, %v412_v40, %v414_v47  ;;  %v417_v51 = vsel %vm415_vm7, %v414_v47, %v412_v40  ;;  %v375_v52 = vpop.permute.xlu0 %374  ;;  %vm546_vm7 = vcmp.lt.s32.totalorder %v1736_v34, 127 }
 0x13e   : > { %v429_v55 = vsel %vm1751_vm9, %v417_v51, 0.0  ;;  %v430_v56 = vsel %vm1755_vm10, %v416_v50, 0.0  ;;  %v379_v57 = vsel %vm378_vm11, %v373_v43, %v375_v52  ;;  %v380_v58 = vsel %vm378_vm11, %v375_v52, %v373_v43  ;;  %vm662_vm11 = vmand %vm296_vm1, %vm298_vm3 }
 0x13f   : > { %v393_v59 = vsel %vm1761_vm12, %v380_v58, 0.0  ;;  %v394_v60 = vsel %vm1765_vm13, %v379_v57, 0.0  ;;  %vm559_vm9 = vcmp.eq.s32.totalorder %v557_v17, 1  ;;  %vm584_vm10 = vcmp.lt.s32.totalorder %v1736_v34, 113 }
 0x140   : > { %v431_v63 = vadd.f32 %v429_v55, %v393_v59  ;;  %v432_v5 = vadd.f32 %v430_v56, %v394_v60  ;;  %v491_v6 = vpop.permute.xlu1 %490  ;;  %vm1819_vm12 = vcmp.eq.s32.totalorder %v592_v27, 1  ;;  %vm1823_vm13 = vcmp.eq.s32.totalorder %v596_v31, 1 }
 0x141   : > { %v489_v11 = vpop.permute.xlu0 %488  ;;  %v663_v0 = vsel %vm662_vm11, 1, %v1265_v30 }
 0x142   : > { %v493_v12 = vsel %vm492_vm14, %v489_v11, %v491_v6  ;;  %v494_v13 = vsel %vm492_vm14, %v491_v6, %v489_v11  ;;  %v671_v53 = vrot.slane %v663_v0, %v1574_v8 }
 0x143   : > { %v506_v15 = vsel %vm1770_vm15, %v494_v13, 0.0  ;;  %v507_v16 = vsel %vm1783_vm0, %v493_v12, 0.0  ;;  %vm659_vm15 = vcmp.lt.s32.totalorder %v1736_v34, 111 }
 0x144   : > { %v524_v19 = vadd.f32 %v522_v35, %v506_v15  ;;  %v525_v20 = vadd.f32 %v523_v28, %v507_v16  ;;  %v452_v21 = vpop.permute.xlu1 %451  ;;  %v624_v28 = vsel %vm296_vm1, 1, %v1265_v30  ;;  %vm621_vm1 = vcmp.lt.s32.totalorder %v1736_v34, 112 }
 0x145   : > { %v450_v22 = vpop.permute.xlu0 %449  ;;  %v628_v4 = vrot.slane %v624_v28, %v1572_v7  ;;  %v632_v2 = vrot.slane %v624_v28, %v1574_v8  ;;  %v667_v30 = vrot.slane %v663_v0, %v1572_v7  ;;  %vm673_vm4 = vcmp.eq.s32.totalorder %v671_v53, 1 }
 0x146   : > { %v454_v23 = vsel %vm453_vm5, %v450_v22, %v452_v21  ;;  %v455_v24 = vsel %vm453_vm5, %v452_v21, %v450_v22  ;;  %v699_v22 = vstv %s904_s28 }
 0x147   : > { %v468_v25 = vsel %vm466_vm2, %v455_v24, 0.0  ;;  %v469_v26 = vsel %vm467_vm6, %v454_v23, 0.0  ;;  %vm633_vm3 = vcmp.eq.s32.totalorder %v628_v4, 1  ;;  %vm634_vm14 = vcmp.eq.s32.totalorder %v632_v2, 1 }
 0x148   : > { %v470_v32 = vadd.f32 %v468_v25, %v431_v63  ;;  %v471_v33 = vadd.f32 %v469_v26, %v432_v5  ;;  %v545_v36 = vpop.permute.xlu1 %544  ;;  %vm672_vm0 = vcmp.eq.s32.totalorder %v667_v30, 1 }
 0x149   : > { %v543_v35 = vpop.permute.xlu0 %542 }
 0x14a   : > { %v547_v29 = vsel %vm546_vm7, %v543_v35, %v545_v36  ;;  %v548_v37 = vsel %vm546_vm7, %v545_v36, %v543_v35 }
 0x14b   : > { %v560_v38 = vsel %vm558_vm8, %v547_v29, 0.0  ;;  %v561_v39 = vsel %vm559_vm9, %v548_v37, 0.0 }
 0x14c   : > { %v562_v42 = vadd.f32 %v560_v38, %v524_v19  ;;  %v563_v43 = vadd.f32 %v561_v39, %v525_v20  ;;  %v583_v44 = vpop.permute.xlu1 %582 }
 0x14d   : > { %v581_v45 = vpop.permute.xlu0 %580 }
 0x14e   : > { %v678_v46 = vadd.f32 %v562_v42, %v470_v32  ;;  %v679_v47 = vadd.f32 %v563_v43, %v471_v33  ;;  %v585_v48 = vsel %vm584_vm10, %v581_v45, %v583_v44  ;;  %v586_v49 = vsel %vm584_vm10, %v583_v44, %v581_v45 }
 0x14f   : > { %v599_v50 = vsel %vm1819_vm12, %v585_v48, 0.0  ;;  %v600_v51 = vsel %vm1823_vm13, %v586_v49, 0.0 }
 0x150   : > { %v620_v52 = vpop.permute.xlu1 %619 }
 0x151   : > { %v618_v54 = vpop.permute.xlu0 %617 }
 0x152   : > { %v622_v55 = vsel %vm621_vm1, %v618_v54, %v620_v52  ;;  %v623_v56 = vsel %vm621_vm1, %v620_v52, %v618_v54 }
 0x153   : > { %v635_v57 = vsel %vm633_vm3, %v622_v55, 0.0  ;;  %v636_v58 = vsel %vm634_vm14, %v623_v56, 0.0 }
 0x154   : > { %v637_v59 = vadd.f32 %v635_v57, %v599_v50  ;;  %v638_v60 = vadd.f32 %v636_v58, %v600_v51  ;;  %v658_v61 = vpop.permute.xlu1 %657 }
 0x155   : > { %v656_v62 = vpop.permute.xlu0 %655 }
 0x156   : > { %v660_v63 = vsel %vm659_vm15, %v656_v62, %v658_v61  ;;  %v661_v5 = vsel %vm659_vm15, %v658_v61, %v656_v62 }
 0x157   : > { %v674_v6 = vsel %vm672_vm0, %v660_v63, 0.0  ;;  %v675_v7 = vsel %vm673_vm4, %v661_v5, 0.0 }
 0x158   : > { %v676_v9 = vadd.f32 %v674_v6, %v637_v59  ;;  %v677_v8 = vadd.f32 %v675_v7, %v638_v60 }
 0x15a   : > { %v680_v11 = vadd.f32 %v678_v46, %v676_v9  ;;  %v681_v12 = vadd.f32 %v679_v47, %v677_v8 }
 0x15c   : > { %v684_v13 = vadd.f32 %v683_v10, %v680_v11  ;;  %v685_v14 = vadd.f32 %v683_v10, %v681_v12 }
 0x15e   : > { %v686_v34 = vsub.f32 0.0, %v684_v13  ;;  %v687_v15 = vsub.f32 0.0, %v685_v14 }
 0x160   : > { %v688_v16 = vmul.f32 1.442695, %v686_v34  ;;  %v690_v17 = vmul.f32 1.442695, %v687_v15 }
 0x162   : > { %1025 = vpow2.f32 %v688_v16 }
 0x163   : > { %1027 = vpow2.f32 %v690_v17 }
 0x16c   : > { %v1026_v18 = vpop.eup %1025 }
 0x16d   : > { %v1028_v19 = vpop.eup %1027  ;;  %v692_v20 = vadd.f32 1.0, %v1026_v18 }
 0x16e   : > { %v693_v21 = vadd.f32 1.0, %v1028_v19 }
 0x16f   : > { %1029 = vrcp.f32 %v692_v20 }
 0x170   : > { %1031 = vrcp.f32 %v693_v21 }
 0x179   : > { %v1030_v23 = vpop.eup %1029 }
 0x17a   : > { %v1032_v24 = vpop.eup %1031  ;;  %v700_v25 = vmul.f32 %v1030_v23, %v699_v22 }
 0x17b   : > { %v701_v26 = vmul.f32 %v1032_v24, %v699_v22 }
 0x17c   : > { %v702_v27 = vmul.f32 %v700_v25, %v1490_v1 }
 0x17d   : > { %v703_v31 = vmul.f32 %v701_v26, %v1503_v3 }
 0x17e   : > { %v704_v32 = vadd.f32 %v702_v27, %v1490_v1 }
 0x17f   : > { %v705_v33 = vadd.f32 %v703_v31, %v1503_v3 }
 0x180   : > { %706 = vst [vmem:[%s1559_s15] sm:$0xff] %v704_v32 }
 0x181   : > { %707 = vst [vmem:[%s1559_s15 + $0x8] sm:$0xff] %v705_v33 }
 0x182   : > { %1152 = shalt.err (!%p1149_p2)
}
 0x183   : > { %s1153_s29 = scalar_lea.hbm %s1852_s6, 256  ;;  %s1157_s12 = scalar_lea.hbm %s1913_s5, 1536 }
 0x184   : > { %p1154_p11 = scmp.ne.s32.totalorder %s1852_s6, %s1153_s29  ;;  %p1158_p6 = scmp.lt.u32.totalorder %s1852_s6, %s1913_s5 }
 0x185   : > { %p1159_p9 = scmp.lt.u32.totalorder %s1157_s12, %s1153_s29  ;;  %p1161_p0 = scmp.lt.u32.totalorder %s1153_s29, %s1852_s6 }
 0x186   : > { %p1155_p4 = pnand %p1154_p11, %p1973_p7 }
 0x187   : > { %p1160_p8 = por %p1159_p9, %p1158_p6 }
 0x188   : > { %p1156_p1 = pneg %p1155_p4 }
 0x189   : > { %p1162_p13 = por %p1161_p0, %p1160_p8 }
 0x18b   : > { %p1163_p12 = pnand %p1162_p13, %p1156_p1 }
 0x18d   : > { %1166 = shalt.err (!%p1163_p12)
}
 0x18e   : > { %924 = dma.vmem_to_hbm [thread:$0]  (%p1973_p7), %s1854_s16, 256, %s1852_s6, %s709_s4  }
 0x18f PF: > { %s1974_s2 = sld [smem:[#allocation20_spill]]  ;;  %s1975_s18 = sld [smem:[#allocation22_spill]] }
 0x190   : > { %p946_p10 = scmp.ge.s32.totalorder %s1249_s25, 2 }
 0x195   : > { %s737_s8 = sand.u32 1, %s1974_s2   ;;  %p1976_p3 = scmp.ne.s32.totalorder %s1975_s18, 0 }
 0x196   : > { %s738_s28 = scalar_lea.sflag [#allocation6], %s737_s8 }
 0x197   : > { %p938_p5 = pnand %p946_p10, %p1976_p3 }
 0x199   : > { %1216 = dma.done.wait (!%p938_p5), %s738_s28, 256  }
 0x19a   : > { %1218 = vsyncadd (!%p938_p5), %s738_s28, 4294967040  ;;  %s23_s25 = sadd.s32 1, %s1249_s25   ;;  %s1977_s22 = sld [smem:[#allocation21_spill]] }
 0x19b   : > { %p20_p2 = scmp.ge.s32.totalorder %s23_s25, 8   ;;  %s1978_s10 = sld [smem:[#allocation23_spill]] }
 0x19c   : > { %s1979_s24 = sld [smem:[#allocation24_spill]]  ;;  %s1980_s18 = smov %s1225_s19 }
 0x19d   : > { %s1981_s19 = smov %s1229_s20  ;;  %s1982_s20 = smov %s1430_s14 }
 0x19e   : > { %s1983_s21 = smov %s1241_s23  ;;  %22 = sbr.rel (!%p20_p2) target bundleno = 14 (0xe), region = 97 }
 0x1a1   : > { %s1984_s23 = smov %s1978_s10 }
 0x1a5   :  { %743 = vsyncpa [#allocation5], 1 }
 0x1a6   :  { %745 = vsyncpa [#allocation5 + $0x1], 1 }
 0x1a7   :  { %746 = vsyncpa [#allocation6], 1 }
 0x1a8   :  { %748 = vsyncpa [#allocation6 + $0x1], 1 }
 0x1a9   :  { %749 = vsyncpa [#allocation7], 1 }
 0x1aa   :  { %751 = vsyncpa [#allocation7 + $0x1], 1 }
 0x1ab   :  { %752 = vsyncpa [#allocation8], 1 }
 0x1ac   :  { %754 = vsyncpa [#allocation8 + $0x1], 1 }
 0x1ad   :  { %755 = vsyncmov [#allocation3] }
 0x1b0   :  { %s756_s14 = vpop.sfrf %755 }
 0x1b1   :  { %p910_p7 = scmp.ne.s32.totalorder %s756_s14, 0 }
 0x1b3   :  { %760 = shalt.err (%p910_p7)  }
 0x1b4   :  { %762 = vsyncmov [#allocation3 + $0x1] }
 0x1b7   :  { %s763_s26 = vpop.sfrf %762 }
 0x1b8   :  { %p911_p11 = scmp.ne.s32.totalorder %s763_s26, 0 }
 0x1ba   :  { %767 = shalt.err (%p911_p11)  }

</bundles_post_ra>
